<compile_context>
chip_gen: v6e
topology: v6e:2x2x1
jax: 0.10.0
libtpu: 0.0.40
codegen_flags: <defaults>
</compile_context>

<pallas_src>
import numpy as np

import jax
import jax.numpy as jnp
from jax import lax
from jax.experimental import pallas as pl
from jax.experimental.pallas import tpu as pltpu

EPS = 1e-5          # PyTorch BatchNorm2d default eps
C = 7               # channels

# column offsets inside the packed parameter slab (shape (72, 128))
_W1_COL, _W2_COL, _VEC_COL, _M1_COL, _M2_COL = 0, 8, 16, 32, 56


def model_kernel(x_ref, p_ref, y_ref):
    """Whole forward pass, gridless.

    x_ref: (7, 36)   input, lane p = h*6 + w
    p_ref: (72, 128) packed params:
             lanes  0:8   conv1 taps stacked, row = tap*8 + cout (cin on lanes)
             lanes  8:16  conv2 taps stacked, same layout
             lanes 16:21  per-channel vectors g1, be1, g2a, g2b, be2b (rows 0..6)
             lanes 32:54  block1 valid-lane mask (16 ones on a 22-lane window)
             lanes 56:64  block2 valid-lane mask (4 ones on an 8-lane window)
    y_ref: (8, 128)  output; rows 0..6, lanes 0..3 hold 2*block2(block1(x))
    """
    # ---- carve the packed parameter slab ---------------------------------
    w1s = p_ref[:, _W1_COL:_W1_COL + 7]          # (72, 7)
    w2s = p_ref[:, _W2_COL:_W2_COL + 8]          # (72, 8)  (col 7 is zero)
    V = p_ref[0:8, _VEC_COL:_VEC_COL + 5]        # (8, 5)
    g1, be1, g2a, g2b, be2b = (V[:, j:j + 1] for j in range(5))
    mask1 = p_ref[0:8, _M1_COL:_M1_COL + 22]     # (8, 22)
    mask2 = p_ref[0:8, _M2_COL:_M2_COL + 8]      # (8, 8)

    # ---- block1 conv: one MXU matmul over all 9 taps + 9 shift-adds ------
    # f1[tap*8+cout, p] = sum_cin w1[cout,cin,kh,kw] * x[cin, p]
    f1 = jnp.dot(w1s, x_ref[...], preferred_element_type=jnp.float32)  # (72, 36)
    s = jnp.zeros((8, 22), jnp.float32)          # valid lanes: p%6 < 4, p <= 21
    for k in range(9):                           # unrolled at trace time
        kh, kw = divmod(k, 3)
        off = kh * 6 + kw
        s = s + f1[k * 8:(k + 1) * 8, off:off + 22]
    # conv bias b1 omitted: a per-channel constant cancels exactly in BN1.

    # ---- BatchNorm1 (training stats over the 16 valid spatial lanes) -----
    m1 = jnp.sum(s * mask1, axis=1, keepdims=True) * (1.0 / 16.0)
    d1 = (s - m1) * mask1
    v1 = jnp.sum(d1 * d1, axis=1, keepdims=True) * (1.0 / 16.0)
    s = g1 * (s - m1) * lax.rsqrt(v1 + EPS) + be1                      # (8, 22)

    # ---- block2 conv: same stacked-tap trick ------------------------------
    f2 = jnp.dot(w2s, s, preferred_element_type=jnp.float32)           # (72, 22)
    t = jnp.zeros((8, 8), jnp.float32)           # valid lanes: {0, 1, 6, 7}
    for k in range(9):
        kh, kw = divmod(k, 3)
        off = kh * 6 + kw
        t = t + f2[k * 8:(k + 1) * 8, off:off + 8]
    # conv bias b2 omitted: cancels in BN2a's mean subtraction.

    # ---- fused BN2a∘BN2b with the final (s2 + s2) folded in ---------------
    m2 = jnp.sum(t * mask2, axis=1, keepdims=True) * 0.25
    d2 = (t - m2) * mask2
    v2 = jnp.sum(d2 * d2, axis=1, keepdims=True) * 0.25
    inv1 = lax.rsqrt(v2 + EPS)                   # 1/sqrt(var2 + eps)
    var_a = (g2a * g2a) * v2 * (inv1 * inv1)     # exact variance of BN2a out
    scale = 2.0 * g2b * g2a * inv1 * lax.rsqrt(var_a + EPS)
    yv = scale * (t - m2) + 2.0 * be2b                                  # (8, 8)

    # ---- densify valid lanes {0,1,6,7} -> {0,1,2,3}; lane-dense store -----
    dense = jnp.concatenate([yv[:, 0:2], yv[:, 6:8]], axis=1)           # (8, 4)
    y_ref[...] = jnp.zeros_like(y_ref)
    y_ref[:, 0:4] = dense


def pack_params(params):
    """Host-side, run ONCE (hoisted out of the per-call path)."""
    def stack_taps(w):                                   # (7,7,3,3) OIHW
        w = np.asarray(w, np.float32)
        s = np.zeros((9, 8, 8), np.float32)              # tap, cout(+pad), cin(+pad)
        s[:, :C, :C] = np.transpose(w, (2, 3, 0, 1)).reshape(9, C, C)
        return s.reshape(72, 8)

    slab = np.zeros((72, 128), np.float32)
    slab[:, _W1_COL:_W1_COL + 8] = stack_taps(params["w1"])
    slab[:, _W2_COL:_W2_COL + 8] = stack_taps(params["w2"])
    for j, name in enumerate(("g1", "be1", "g2a", "g2b", "be2b")):
        slab[:C, _VEC_COL + j] = np.asarray(params[name], np.float32)
    lanes22 = np.arange(22)
    slab[:, _M1_COL:_M1_COL + 22] = ((lanes22 % 6) < 4).astype(np.float32)[None, :]
    lanes8 = np.arange(8)
    slab[:, _M2_COL:_M2_COL + 8] = ((lanes8 % 6) < 2).astype(np.float32)[None, :]
    return jnp.asarray(slab)


@jax.jit
def model_forward(x, slab):
    x_flat = x.reshape(C, 36)                    # free reshape of (1,7,6,6)
    vmem = pl.BlockSpec(memory_space=pltpu.MemorySpace.VMEM)
    y = pl.pallas_call(
        model_kernel,
        out_shape=jax.ShapeDtypeStruct((8, 128), jnp.float32),
        in_specs=[vmem, vmem],
        out_specs=vmem,
    )(x_flat, slab)
    return y[:C, :4].reshape(1, C, 2, 2)


def init_params(key):
    """Parameter init; BN affine params randomized to exercise the fused BN."""
    ks = jax.random.split(key, 10)
    bound = 1.0 / (C * 3 * 3) ** 0.5
    return {
        "w1": jax.random.uniform(ks[0], (C, C, 3, 3), jnp.float32, -bound, bound),
        "b1": jax.random.uniform(ks[1], (C,), jnp.float32, -bound, bound),
        "w2": jax.random.uniform(ks[2], (C, C, 3, 3), jnp.float32, -bound, bound),
        "b2": jax.random.uniform(ks[3], (C,), jnp.float32, -bound, bound),
        "g1":   jax.random.uniform(ks[4], (C,), jnp.float32, 0.5, 1.5),
        "be1":  jax.random.uniform(ks[5], (C,), jnp.float32, -0.5, 0.5),
        "g2a":  jax.random.uniform(ks[6], (C,), jnp.float32, 0.5, 1.5),
        "be2a": jax.random.uniform(ks[7], (C,), jnp.float32, -0.5, 0.5),
        "g2b":  jax.random.uniform(ks[8], (C,), jnp.float32, 0.5, 1.5),
        "be2b": jax.random.uniform(ks[9], (C,), jnp.float32, -0.5, 0.5),
    }


def reference_forward(x, params):
    """Pure-JAX reference matching PyTorch training-mode semantics."""
    def conv(x, w, b):
        y = lax.conv_general_dilated(x, w, (1, 1), "VALID",
                                     dimension_numbers=("NCHW", "OIHW", "NCHW"),
                                     precision=lax.Precision.HIGHEST)
        return y + b.reshape(1, -1, 1, 1)

    def bn(x, g, bt):
        m = jnp.mean(x, axis=(0, 2, 3), keepdims=True)
        v = jnp.mean((x - m) ** 2, axis=(0, 2, 3), keepdims=True)
        return (g.reshape(1, -1, 1, 1) * (x - m) * lax.rsqrt(v + EPS)
                + bt.reshape(1, -1, 1, 1))

    s = bn(conv(x, params["w1"], params["b1"]), params["g1"], params["be1"])
    s = conv(s, params["w2"], params["b2"])
    s = bn(s, params["g2a"], params["be2a"])
    s = bn(s, params["g2b"], params["be2b"])
    return s + s


if __name__ == "__main__":
    key = jax.random.PRNGKey(0)
    kx, kp = jax.random.split(key)
    x2 = jax.random.normal(kx, (1, C, 6, 6), jnp.float32)
    params = init_params(kp)
    slab = pack_params(params)            # packed once, outside the jit path

    y2 = model_forward(x2, slab)
    jax.block_until_ready(y2)
    assert y2.shape == (1, C, 2, 2) and y2.dtype == jnp.float32

    y_ref = reference_forward(x2, params)
    max_err = float(jnp.max(jnp.abs(y2 - y_ref)))
    assert jnp.allclose(y2, y_ref, atol=1e-2, rtol=1e-2), f"max abs err {max_err}"
    print("KERNEL_OK")
</pallas_src>

<mosaic_0001>
module attributes {stable_mosaic.version = 11 : i64} {
  func.func @model_kernel(%arg0: memref<7x36xf32, #tpu.memory_space<vmem>>, %arg1: memref<72x128xf32, #tpu.memory_space<vmem>>, %arg2: memref<8x128xf32, #tpu.memory_space<vmem>>) attributes {dimension_semantics = [], scalar_prefetch = 0 : i64, scratch_operands = 0 : i64, tpu.core_type = #tpu.core_type<tc>} {
    %c0 = arith.constant 0 : index
    %c0_0 = arith.constant 0 : index
    %0 = vector.load %arg1[%c0, %c0_0] : memref<72x128xf32, #tpu.memory_space<vmem>>, vector<72x7xf32>
    %c0_1 = arith.constant 0 : index
    %c8 = arith.constant 8 : index
    %1 = vector.load %arg1[%c0_1, %c8] : memref<72x128xf32, #tpu.memory_space<vmem>>, vector<72x8xf32>
    %c0_2 = arith.constant 0 : index
    %c16 = arith.constant 16 : index
    %2 = vector.load %arg1[%c0_2, %c16] : memref<72x128xf32, #tpu.memory_space<vmem>>, vector<8x5xf32>
    %3 = vector.extract_strided_slice %2 {offsets = [0, 0], sizes = [8, 1], strides = [1, 1]} : vector<8x5xf32> to vector<8x1xf32>
    %4 = vector.extract_strided_slice %2 {offsets = [0, 1], sizes = [8, 1], strides = [1, 1]} : vector<8x5xf32> to vector<8x1xf32>
    %5 = vector.extract_strided_slice %2 {offsets = [0, 2], sizes = [8, 1], strides = [1, 1]} : vector<8x5xf32> to vector<8x1xf32>
    %6 = vector.extract_strided_slice %2 {offsets = [0, 3], sizes = [8, 1], strides = [1, 1]} : vector<8x5xf32> to vector<8x1xf32>
    %7 = vector.extract_strided_slice %2 {offsets = [0, 4], sizes = [8, 1], strides = [1, 1]} : vector<8x5xf32> to vector<8x1xf32>
    %c0_3 = arith.constant 0 : index
    %c32 = arith.constant 32 : index
    %8 = vector.load %arg1[%c0_3, %c32] : memref<72x128xf32, #tpu.memory_space<vmem>>, vector<8x22xf32>
    %c0_4 = arith.constant 0 : index
    %c56 = arith.constant 56 : index
    %9 = vector.load %arg1[%c0_4, %c56] : memref<72x128xf32, #tpu.memory_space<vmem>>, vector<8x8xf32>
    %c0_5 = arith.constant 0 : index
    %c0_6 = arith.constant 0 : index
    %10 = vector.load %arg0[%c0_5, %c0_6] : memref<7x36xf32, #tpu.memory_space<vmem>>, vector<7x36xf32>
    %cst = arith.constant dense<0.000000e+00> : vector<72x36xf32>
    %11 = tpu.matmul %0, %10, %cst {dimension_numbers = #tpu.dot_dimension_numbers<[1], [0], [0], [1], [0, 0, 1, 1], [], []>} : vector<72x7xf32>, vector<7x36xf32>, vector<72x36xf32> -> vector<72x36xf32>
    %cst_7 = arith.constant 0.000000e+00 : f32
    %12 = vector.broadcast %cst_7 : f32 to vector<8x22xf32>
    %13 = vector.extract_strided_slice %11 {offsets = [0, 0], sizes = [8, 22], strides = [1, 1]} : vector<72x36xf32> to vector<8x22xf32>
    %14 = arith.addf %12, %13 : vector<8x22xf32>
    %15 = vector.extract_strided_slice %11 {offsets = [8, 1], sizes = [8, 22], strides = [1, 1]} : vector<72x36xf32> to vector<8x22xf32>
    %16 = arith.addf %14, %15 : vector<8x22xf32>
    %17 = vector.extract_strided_slice %11 {offsets = [16, 2], sizes = [8, 22], strides = [1, 1]} : vector<72x36xf32> to vector<8x22xf32>
    %18 = arith.addf %16, %17 : vector<8x22xf32>
    %19 = vector.extract_strided_slice %11 {offsets = [24, 6], sizes = [8, 22], strides = [1, 1]} : vector<72x36xf32> to vector<8x22xf32>
    %20 = arith.addf %18, %19 : vector<8x22xf32>
    %21 = vector.extract_strided_slice %11 {offsets = [32, 7], sizes = [8, 22], strides = [1, 1]} : vector<72x36xf32> to vector<8x22xf32>
    %22 = arith.addf %20, %21 : vector<8x22xf32>
    %23 = vector.extract_strided_slice %11 {offsets = [40, 8], sizes = [8, 22], strides = [1, 1]} : vector<72x36xf32> to vector<8x22xf32>
    %24 = arith.addf %22, %23 : vector<8x22xf32>
    %25 = vector.extract_strided_slice %11 {offsets = [48, 12], sizes = [8, 22], strides = [1, 1]} : vector<72x36xf32> to vector<8x22xf32>
    %26 = arith.addf %24, %25 : vector<8x22xf32>
    %27 = vector.extract_strided_slice %11 {offsets = [56, 13], sizes = [8, 22], strides = [1, 1]} : vector<72x36xf32> to vector<8x22xf32>
    %28 = arith.addf %26, %27 : vector<8x22xf32>
    %29 = vector.extract_strided_slice %11 {offsets = [64, 14], sizes = [8, 22], strides = [1, 1]} : vector<72x36xf32> to vector<8x22xf32>
    %30 = arith.addf %28, %29 : vector<8x22xf32>
    %31 = arith.mulf %30, %8 : vector<8x22xf32>
    %cst_8 = arith.constant dense<0.000000e+00> : vector<8xf32>
    %32 = vector.multi_reduction <add>, %31, %cst_8 [1] : vector<8x22xf32> to vector<8xf32>
    %33 = vector.shape_cast %32 : vector<8xf32> to vector<8x1xf32>
    %cst_9 = arith.constant 6.250000e-02 : f32
    %34 = vector.broadcast %cst_9 : f32 to vector<8x1xf32>
    %35 = arith.mulf %33, %34 : vector<8x1xf32>
    %36 = vector.broadcast %35 : vector<8x1xf32> to vector<8x22xf32>
    %37 = arith.subf %30, %36 : vector<8x22xf32>
    %38 = arith.mulf %37, %8 : vector<8x22xf32>
    %39 = arith.mulf %38, %38 : vector<8x22xf32>
    %cst_10 = arith.constant dense<0.000000e+00> : vector<8xf32>
    %40 = vector.multi_reduction <add>, %39, %cst_10 [1] : vector<8x22xf32> to vector<8xf32>
    %41 = vector.shape_cast %40 : vector<8xf32> to vector<8x1xf32>
    %cst_11 = arith.constant 6.250000e-02 : f32
    %42 = vector.broadcast %cst_11 : f32 to vector<8x1xf32>
    %43 = arith.mulf %41, %42 : vector<8x1xf32>
    %44 = vector.broadcast %35 : vector<8x1xf32> to vector<8x22xf32>
    %45 = arith.subf %30, %44 : vector<8x22xf32>
    %46 = vector.broadcast %3 : vector<8x1xf32> to vector<8x22xf32>
    %47 = arith.mulf %46, %45 : vector<8x22xf32>
    %cst_12 = arith.constant 9.99999974E-6 : f32
    %48 = vector.broadcast %cst_12 : f32 to vector<8x1xf32>
    %49 = arith.addf %43, %48 : vector<8x1xf32>
    %50 = math.rsqrt %49 : vector<8x1xf32>
    %51 = vector.broadcast %50 : vector<8x1xf32> to vector<8x22xf32>
    %52 = arith.mulf %47, %51 : vector<8x22xf32>
    %53 = vector.broadcast %4 : vector<8x1xf32> to vector<8x22xf32>
    %54 = arith.addf %52, %53 : vector<8x22xf32>
    %cst_13 = arith.constant dense<0.000000e+00> : vector<72x22xf32>
    %55 = tpu.matmul %1, %54, %cst_13 {dimension_numbers = #tpu.dot_dimension_numbers<[1], [0], [0], [1], [0, 0, 1, 1], [], []>} : vector<72x8xf32>, vector<8x22xf32>, vector<72x22xf32> -> vector<72x22xf32>
    %cst_14 = arith.constant 0.000000e+00 : f32
    %56 = vector.broadcast %cst_14 : f32 to vector<8x8xf32>
    %57 = vector.extract_strided_slice %55 {offsets = [0, 0], sizes = [8, 8], strides = [1, 1]} : vector<72x22xf32> to vector<8x8xf32>
    %58 = arith.addf %56, %57 : vector<8x8xf32>
    %59 = vector.extract_strided_slice %55 {offsets = [8, 1], sizes = [8, 8], strides = [1, 1]} : vector<72x22xf32> to vector<8x8xf32>
    %60 = arith.addf %58, %59 : vector<8x8xf32>
    %61 = vector.extract_strided_slice %55 {offsets = [16, 2], sizes = [8, 8], strides = [1, 1]} : vector<72x22xf32> to vector<8x8xf32>
    %62 = arith.addf %60, %61 : vector<8x8xf32>
    %63 = vector.extract_strided_slice %55 {offsets = [24, 6], sizes = [8, 8], strides = [1, 1]} : vector<72x22xf32> to vector<8x8xf32>
    %64 = arith.addf %62, %63 : vector<8x8xf32>
    %65 = vector.extract_strided_slice %55 {offsets = [32, 7], sizes = [8, 8], strides = [1, 1]} : vector<72x22xf32> to vector<8x8xf32>
    %66 = arith.addf %64, %65 : vector<8x8xf32>
    %67 = vector.extract_strided_slice %55 {offsets = [40, 8], sizes = [8, 8], strides = [1, 1]} : vector<72x22xf32> to vector<8x8xf32>
    %68 = arith.addf %66, %67 : vector<8x8xf32>
    %69 = vector.extract_strided_slice %55 {offsets = [48, 12], sizes = [8, 8], strides = [1, 1]} : vector<72x22xf32> to vector<8x8xf32>
    %70 = arith.addf %68, %69 : vector<8x8xf32>
    %71 = vector.extract_strided_slice %55 {offsets = [56, 13], sizes = [8, 8], strides = [1, 1]} : vector<72x22xf32> to vector<8x8xf32>
    %72 = arith.addf %70, %71 : vector<8x8xf32>
    %73 = vector.extract_strided_slice %55 {offsets = [64, 14], sizes = [8, 8], strides = [1, 1]} : vector<72x22xf32> to vector<8x8xf32>
    %74 = arith.addf %72, %73 : vector<8x8xf32>
    %75 = arith.mulf %74, %9 : vector<8x8xf32>
    %cst_15 = arith.constant dense<0.000000e+00> : vector<8xf32>
    %76 = vector.multi_reduction <add>, %75, %cst_15 [1] : vector<8x8xf32> to vector<8xf32>
    %77 = vector.shape_cast %76 : vector<8xf32> to vector<8x1xf32>
    %cst_16 = arith.constant 2.500000e-01 : f32
    %78 = vector.broadcast %cst_16 : f32 to vector<8x1xf32>
    %79 = arith.mulf %77, %78 : vector<8x1xf32>
    %80 = vector.broadcast %79 : vector<8x1xf32> to vector<8x8xf32>
    %81 = arith.subf %74, %80 : vector<8x8xf32>
    %82 = arith.mulf %81, %9 : vector<8x8xf32>
    %83 = arith.mulf %82, %82 : vector<8x8xf32>
    %cst_17 = arith.constant dense<0.000000e+00> : vector<8xf32>
    %84 = vector.multi_reduction <add>, %83, %cst_17 [1] : vector<8x8xf32> to vector<8xf32>
    %85 = vector.shape_cast %84 : vector<8xf32> to vector<8x1xf32>
    %cst_18 = arith.constant 2.500000e-01 : f32
    %86 = vector.broadcast %cst_18 : f32 to vector<8x1xf32>
    %87 = arith.mulf %85, %86 : vector<8x1xf32>
    %cst_19 = arith.constant 9.99999974E-6 : f32
    %88 = vector.broadcast %cst_19 : f32 to vector<8x1xf32>
    %89 = arith.addf %87, %88 : vector<8x1xf32>
    %90 = math.rsqrt %89 : vector<8x1xf32>
    %91 = arith.mulf %5, %5 : vector<8x1xf32>
    %92 = arith.mulf %91, %87 : vector<8x1xf32>
    %93 = arith.mulf %90, %90 : vector<8x1xf32>
    %94 = arith.mulf %92, %93 : vector<8x1xf32>
    %cst_20 = arith.constant 2.000000e+00 : f32
    %95 = vector.broadcast %cst_20 : f32 to vector<8x1xf32>
    %96 = arith.mulf %95, %6 : vector<8x1xf32>
    %97 = arith.mulf %96, %5 : vector<8x1xf32>
    %98 = arith.mulf %97, %90 : vector<8x1xf32>
    %cst_21 = arith.constant 9.99999974E-6 : f32
    %99 = vector.broadcast %cst_21 : f32 to vector<8x1xf32>
    %100 = arith.addf %94, %99 : vector<8x1xf32>
    %101 = math.rsqrt %100 : vector<8x1xf32>
    %102 = arith.mulf %98, %101 : vector<8x1xf32>
    %103 = vector.broadcast %79 : vector<8x1xf32> to vector<8x8xf32>
    %104 = arith.subf %74, %103 : vector<8x8xf32>
    %105 = vector.broadcast %102 : vector<8x1xf32> to vector<8x8xf32>
    %106 = arith.mulf %105, %104 : vector<8x8xf32>
    %cst_22 = arith.constant 2.000000e+00 : f32
    %107 = vector.broadcast %cst_22 : f32 to vector<8x1xf32>
    %108 = arith.mulf %107, %7 : vector<8x1xf32>
    %109 = vector.broadcast %108 : vector<8x1xf32> to vector<8x8xf32>
    %110 = arith.addf %106, %109 : vector<8x8xf32>
    %111 = vector.extract_strided_slice %110 {offsets = [0, 0], sizes = [8, 2], strides = [1, 1]} : vector<8x8xf32> to vector<8x2xf32>
    %112 = vector.extract_strided_slice %110 {offsets = [0, 6], sizes = [8, 2], strides = [1, 1]} : vector<8x8xf32> to vector<8x2xf32>
    %113 = tpu.concatenate %111, %112 in 1 : vector<8x2xf32>, vector<8x2xf32> -> vector<8x4xf32>
    %cst_23 = arith.constant 0.000000e+00 : f32
    %114 = vector.broadcast %cst_23 : f32 to vector<8x128xf32>
    %c0_24 = arith.constant 0 : index
    %c0_25 = arith.constant 0 : index
    %115 = vector.load %arg2[%c0_24, %c0_25] : memref<8x128xf32, #tpu.memory_space<vmem>>, vector<8x128xf32>
    tpu.vector_store %arg2[%c0_24, %c0_25], %114 {strides = array<i32>} : memref<8x128xf32, #tpu.memory_space<vmem>>, vector<8x128xf32>,
    %c0_26 = arith.constant 0 : index
    %c0_27 = arith.constant 0 : index
    %116 = vector.load %arg2[%c0_26, %c0_27] : memref<8x128xf32, #tpu.memory_space<vmem>>, vector<8x4xf32>
    tpu.vector_store %arg2[%c0_26, %c0_27], %113 {strides = array<i32>} : memref<8x128xf32, #tpu.memory_space<vmem>>, vector<8x4xf32>,
    return
  }
}

</mosaic_0001>

<bundles_post_ra>
// kernel: model_forward.1
= control target key start
LH: loop header
LB: loop body
LE: loop exit
PB: predicated region body
PF: predicated region fallthrough
CT: control target
= control target key end

     0   :  { %vm50_vm0 = vcmask 1046528   ;;  %vm22_vm1 = vcmask 56320   ;;  %v607_v0 = vmov 0.0   ;;  %vm608_vm2 = vmmov 0   ;;  %s609_s28 = smov 127   ;;  %s610_s29 = smov 126   ;;  %s806_s0 = inlined_call_operand.vmem [shape: f32[7,36], index: 0, kind: input, shape index: {}]   ;;  %s807_s1 = inlined_call_operand.vmem [shape: f32[72,128], index: 1, kind: input, shape index: {}]   ;;  %s808_s2 = inlined_call_operand.vmem [shape: f32[8,128], index: 2, kind: output, shape index: {}]  }
   0x1   :  { %521 = vmatprep.subr.mxu0 %v607_v0  ;;  %v21_v1 = vld [vmem:[%s806_s0] sm:$0x7f]  ;;  %523 = vmatprep.mubr.msk.f32.mxu0 %vm608_vm2, %v607_v0  ;;  %v661_v3 = vld [vmem:[%s807_s1 + $0x8] sm:$0xff]  ;;  %v670_v4 = vld [vmem:[%s807_s1 + $0x10] sm:$0xff]  ;;  %s611_s30 = smov 122   ;;  %s613_s3 = smov 120   ;;  %475 = vst [vmem:[%s808_s2] sm:$0xff] %v607_v0 }
   0x2   :  { %v649_v2 = vld [vmem:[%s807_s1] sm:$0xff]  ;;  %522 = vmatpush3.msk.msra.mxu0 %vm50_vm0, %v21_v1  ;;  %550 = vmatprep.subr.mxu1 %v607_v0  ;;  %v679_v5 = vld [vmem:[%s807_s1 + $0x18] sm:$0xff]  ;;  %v697_v7 = vld [vmem:[%s807_s1 + $0x28] sm:$0xff]  ;;  %s614_s4 = smov 116   ;;  %s615_s5 = smov 115   ;;  %vm210_vm3 = vcmask 179200  }
   0x3   :  { %524 = vmatmul.mubr.msk.f32.vlgmr.msra.gmra.mxu0 %vm22_vm1, %v649_v2  ;;  %552 = vmatprep.mubr.msk.f32.mxu1 %vm608_vm2, %v607_v0  ;;  %v688_v6 = vld [vmem:[%s807_s1 + $0x20] sm:$0xff]  ;;  %v706_v8 = vld [vmem:[%s807_s1 + $0x30] sm:$0xff]  ;;  %v715_v9 = vld [vmem:[%s807_s1 + $0x38] sm:$0xff]  ;;  %s616_s6 = smov 114   ;;  %s617_s7 = smov 96   ;;  %v618_v48 = vmov 16  }
   0x4   :  { %526 = vmatprep.mubr.msk.f32.mxu0 %vm608_vm2, %v607_v0  ;;  %v724_v10 = vld [vmem:[%s807_s1 + $0x40] sm:$0xff]  ;;  %s612_s1 = smov 121   ;;  %597 = vset.pattern.permute.xlu0 %v618_v48  ;;  %v619_v49 = vmov 17   ;;  %vm253_vm4 = vcmask 64512   ;;  %s620_s8 = smov 72   ;;  %vm473_vm5 = vcmask 15360  }
   0x5   :  { %598 = vset.pattern.permute.xlu1 %v619_v49  ;;  %s621_s9 = smov 1   ;;  %s624_s12 = smov 124   ;;  %vm476_vm6 = vcmask 31744  }
   0x7   :  { %527 = vmatmul.mubr.msk.f32.gmra.mxu0 %vm22_vm1, %v661_v3 }
   0x8   :  { %529 = vmatprep.mubr.msk.f32.mxu0 %vm608_vm2, %v607_v0 }
   0xb   :  { %530 = vmatmul.mubr.msk.f32.gmra.mxu0 %vm22_vm1, %v670_v4 }
   0xc   :  { %532 = vmatprep.mubr.msk.f32.mxu0 %vm608_vm2, %v607_v0 }
   0xf   :  { %533 = vmatmul.mubr.msk.f32.gmra.mxu0 %vm22_vm1, %v679_v5 }
  0x10   :  { %535 = vmatprep.mubr.msk.f32.mxu0 %vm608_vm2, %v607_v0 }
  0x13   :  { %536 = vmatmul.mubr.msk.f32.gmra.mxu0 %vm22_vm1, %v688_v6 }
  0x14   :  { %538 = vmatprep.mubr.msk.f32.mxu0 %vm608_vm2, %v607_v0 }
  0x17   :  { %539 = vmatmul.mubr.msk.f32.gmra.mxu0 %vm22_vm1, %v697_v7 }
  0x18   :  { %541 = vmatprep.mubr.msk.f32.mxu0 %vm608_vm2, %v607_v0 }
  0x1b   :  { %542 = vmatmul.mubr.msk.f32.gmra.mxu0 %vm22_vm1, %v706_v8 }
  0x1c   :  { %544 = vmatprep.mubr.msk.f32.mxu0 %vm608_vm2, %v607_v0 }
  0x1f   :  { %545 = vmatmul.mubr.msk.f32.gmra.mxu0 %vm22_vm1, %v715_v9 }
  0x20   :  { %547 = vmatprep.mubr.msk.f32.mxu0 %vm608_vm2, %v607_v0 }
  0x23   :  { %548 = vmatmul.mubr.msk.f32.gmra.mxu0 %vm22_vm1, %v724_v10 }
  0xc3   :  { %v120_v11 = vpop.f32.mrf.mxu0 }
  0xc5   :  { %v525_v12 = vpop.f32.mrf.mxu0 }
  0xc7   :  { %v125_v13 = vpop.f32.mrf.mxu0 }
  0xc8   :  { %166 = vrot.lane.b32.xlu0 %v125_v13, %s609_s28 }
  0xc9   :  { %v528_v14 = vpop.f32.mrf.mxu0 }
  0xcb   :  { %v130_v15 = vpop.f32.mrf.mxu0 }
  0xcc   :  { %171 = vrot.lane.b32.xlu0 %v130_v15, %s610_s29 }
  0xcd   :  { %v531_v16 = vpop.f32.mrf.mxu0 }
  0xcf   :  { %v135_v17 = vpop.f32.mrf.mxu0 }
  0xd0   :  { %176 = vrot.lane.b32.xlu1 %v135_v17, %s611_s30 }
  0xd1   :  { %v534_v18 = vpop.f32.mrf.mxu0 }
  0xd3   :  { %v140_v19 = vpop.f32.mrf.mxu0 }
  0xd4   :  { %181 = vrot.lane.b32.xlu1 %v140_v19, %s612_s1 }
  0xd5   :  { %v537_v20 = vpop.f32.mrf.mxu0 }
  0xd7   :  { %v145_v21 = vpop.f32.mrf.mxu0 }
  0xd8   :  { %186 = vrot.lane.b32.xlu0 %v145_v21, %s613_s3 }
  0xd9   :  { %v540_v22 = vpop.f32.mrf.mxu0 }
  0xdb   :  { %v150_v23 = vpop.f32.mrf.mxu0 }
  0xdc   :  { %191 = vrot.lane.b32.xlu1 %v150_v23, %s614_s4 }
  0xdd   :  { %v543_v24 = vpop.f32.mrf.mxu0 }
  0xdf   :  { %v155_v25 = vpop.f32.mrf.mxu0 }
  0xe0   :  { %196 = vrot.lane.b32.xlu0 %v155_v25, %s615_s5 }
  0xe1   :  { %v546_v26 = vpop.f32.mrf.mxu0 }
  0xe3   :  { %v160_v27 = vpop.f32.mrf.mxu0 }
  0xe4   :  { %201 = vrot.lane.b32.xlu1 %v160_v27, %s616_s6  ;;  %206 = vrot.lane.b32.xlu0 %v649_v2, %s617_s7 }
  0xe5   :  { %v549_v28 = vpop.f32.mrf.mxu0 }
 0x13a   :  { %v167_v29 = vpop.permute.xlu0 %166 }
 0x13b   :  { %v169_v32 = vadd.f32 %v167_v29, %v120_v11 }
 0x13e   :  { %v172_v31 = vpop.permute.xlu0 %171 }
 0x13f   :  { %v174_v33 = vadd.f32 %v172_v31, %v169_v32 }
 0x142   :  { %v177_v30 = vpop.permute.xlu1 %176 }
 0x143   :  { %v179_v35 = vadd.f32 %v177_v30, %v174_v33 }
 0x146   :  { %v182_v34 = vpop.permute.xlu1 %181 }
 0x147   :  { %v184_v37 = vadd.f32 %v182_v34, %v179_v35 }
 0x14a   :  { %v187_v36 = vpop.permute.xlu0 %186 }
 0x14b   :  { %v189_v39 = vadd.f32 %v187_v36, %v184_v37 }
 0x14e   :  { %v192_v38 = vpop.permute.xlu1 %191 }
 0x14f   :  { %v194_v41 = vadd.f32 %v192_v38, %v189_v39 }
 0x152   :  { %v197_v40 = vpop.permute.xlu0 %196 }
 0x153   :  { %v199_v42 = vadd.f32 %v197_v40, %v194_v41 }
 0x156   :  { %v202_v43 = vpop.permute.xlu1 %201  ;;  %v207_v44 = vpop.permute.xlu0 %206 }
 0x157   :  { %v204_v45 = vadd.f32 %v202_v43, %v199_v42 }
 0x159   :  { %v209_v46 = vmul.f32 %v207_v44, %v204_v45 }
 0x15b   :  { %v211_v47 = vsel %vm210_vm3, %v209_v46, 0.0 }
 0x15c   :  { %212 = vadd.xlane.f32.xlu1 %v211_v47 }
 0x16d   :  { %231 = vperm.xlu1 %598, %v649_v2  }
 0x171   :  { %235 = vrot.lane.b32.xlu1 %v649_v2, %s613_s3 }
 0x175   :  { %237 = vrot.lane.b32.xlu1 %v661_v3, %s613_s3 }
 0x179   :  { %239 = vrot.lane.b32.xlu1 %v670_v4, %s613_s3 }
 0x17d   :  { %241 = vrot.lane.b32.xlu1 %v679_v5, %s613_s3 }
 0x181   :  { %243 = vrot.lane.b32.xlu1 %v688_v6, %s613_s3 }
 0x185   :  { %245 = vrot.lane.b32.xlu1 %v697_v7, %s613_s3 }
 0x189   :  { %247 = vrot.lane.b32.xlu1 %v706_v8, %s613_s3 }
 0x18d   :  { %251 = vrot.lane.b32.xlu1 %v724_v10, %s613_s3 }
 0x1e5   :  { %v213_v50 = vpop.xlane.xlu1 %212 }
 0x1e6   :  { %v214_v51 = vmul.f32 0.0625, %v213_v50 }
 0x1e8   :  { %v215_v52 = vsub.f32 %v204_v45, %v214_v51 }
 0x1e9   :  { %v232_v59 = vpop.permute.xlu1 %231 }
 0x1ea   :  { %v216_v53 = vmul.f32 %v215_v52, %v207_v44 }
 0x1ec   :  { %v217_v54 = vmul.f32 %v216_v53, %v216_v53 }
 0x1ed   :  { %v236_v60 = vpop.permute.xlu1 %235 }
 0x1ee   :  { %v218_v55 = vsel %vm210_vm3, %v217_v54, 0.0 }
 0x1ef   :  { %219 = vadd.xlane.f32.xlu0 %v218_v55 }
 0x1f1   :  { %v238_v62 = vpop.permute.xlu1 %237 }
 0x1f5   :  { %v240_v5 = vpop.permute.xlu1 %239 }
 0x1f9   :  { %v242_v6 = vpop.permute.xlu1 %241 }
 0x1fd   :  { %v244_v7 = vpop.permute.xlu1 %243 }
 0x201   :  { %v246_v8 = vpop.permute.xlu1 %245 }
 0x205   :  { %223 = vperm.xlu0 %597, %v649_v2  }
 0x209   :  { %249 = vrot.lane.b32.xlu0 %v715_v9, %s613_s3  ;;  %v248_v9 = vpop.permute.xlu1 %247 }
 0x20d   :  { %v252_v11 = vpop.permute.xlu1 %251 }
 0x278   :  { %v220_v56 = vpop.xlane.xlu0 %219 }
 0x279   :  { %v221_v57 = vmul.f32 0.0625, %v220_v56 }
 0x27b   :  { %v227_v58 = vadd.f32 1e-05, %v221_v57 }
 0x27d   :  { %601 = vrsqrt.f32 %v227_v58  ;;  %v444_v58 = vmul.f32 2.0, %v649_v2 }
 0x280   :  { %v224_v61 = vpop.permute.xlu0 %223 }
 0x281   :  { %v226_v63 = vmul.f32 %v224_v61, %v215_v52 }
 0x284   :  { %v250_v10 = vpop.permute.xlu0 %249 }
 0x28a   :  { %v602_v1 = vpop.eup %601 }
 0x28b   :  { %v229_v3 = vmul.f32 %v602_v1, %v226_v63 }
 0x28d   :  { %v234_v4 = vadd.f32 %v232_v59, %v229_v3 }
 0x28f   :  { %551 = vmatpush3.msra.mxu1 %v234_v4 }
 0x290   :  { %553 = vmatmul.mubr.msk.f32.vlgmr.msra.gmra.mxu1 %vm253_vm4, %v236_v60  ;;  %v440_v60 = vmul.f32 %v649_v2, %v649_v2 }
 0x291   :  { %555 = vmatprep.mubr.msk.f32.mxu1 %vm608_vm2, %v607_v0 }
 0x294   :  { %556 = vmatmul.mubr.msk.f32.gmra.mxu1 %vm253_vm4, %v238_v62 }
 0x295   :  { %558 = vmatprep.mubr.msk.f32.mxu1 %vm608_vm2, %v607_v0 }
 0x298   :  { %559 = vmatmul.mubr.msk.f32.gmra.mxu1 %vm253_vm4, %v240_v5 }
 0x299   :  { %561 = vmatprep.mubr.msk.f32.mxu1 %vm608_vm2, %v607_v0 }
 0x29c   :  { %562 = vmatmul.mubr.msk.f32.gmra.mxu1 %vm253_vm4, %v242_v6  ;;  %v622_v6 = vmov 19  }
 0x29d   :  { %564 = vmatprep.mubr.msk.f32.mxu1 %vm608_vm2, %v607_v0  ;;  %599 = vset.pattern.permute.xlu1 %v622_v6 }
 0x2a0   :  { %565 = vmatmul.mubr.msk.f32.gmra.mxu1 %vm253_vm4, %v244_v7  ;;  %v623_v7 = vmov 20  }
 0x2a1   :  { %567 = vmatprep.mubr.msk.f32.mxu1 %vm608_vm2, %v607_v0  ;;  %600 = vset.pattern.permute.xlu0 %v623_v7 }
 0x2a4   :  { %568 = vmatmul.mubr.msk.f32.gmra.mxu1 %vm253_vm4, %v246_v8 }
 0x2a5   :  { %570 = vmatprep.mubr.msk.f32.mxu1 %vm608_vm2, %v607_v0 }
 0x2a8   :  { %571 = vmatmul.mubr.msk.f32.gmra.mxu1 %vm253_vm4, %v248_v9 }
 0x2a9   :  { %573 = vmatprep.mubr.msk.f32.mxu1 %vm608_vm2, %v607_v0 }
 0x2ac   :  { %574 = vmatmul.mubr.msk.f32.gmra.mxu1 %vm253_vm4, %v250_v10 }
 0x2ad   :  { %576 = vmatprep.mubr.msk.f32.mxu1 %vm608_vm2, %v607_v0 }
 0x2b0   :  { %577 = vmatmul.mubr.msk.f32.gmra.mxu1 %vm253_vm4, %v252_v11 }
 0x350   :  { %v338_v12 = vpop.f32.mrf.mxu1 }
 0x352   :  { %v554_v13 = vpop.f32.mrf.mxu1 }
 0x354   :  { %v343_v14 = vpop.f32.mrf.mxu1 }
 0x355   :  { %384 = vrot.lane.b32.xlu0 %v343_v14, %s609_s28 }
 0x356   :  { %v557_v15 = vpop.f32.mrf.mxu1 }
 0x358   :  { %v348_v16 = vpop.f32.mrf.mxu1 }
 0x359   :  { %389 = vrot.lane.b32.xlu1 %v348_v16, %s610_s29 }
 0x35a   :  { %v560_v17 = vpop.f32.mrf.mxu1 }
 0x35c   :  { %v353_v18 = vpop.f32.mrf.mxu1 }
 0x35d   :  { %394 = vrot.lane.b32.xlu0 %v353_v18, %s611_s30 }
 0x35e   :  { %v563_v19 = vpop.f32.mrf.mxu1 }
 0x360   :  { %v358_v20 = vpop.f32.mrf.mxu1 }
 0x361   :  { %399 = vrot.lane.b32.xlu1 %v358_v20, %s612_s1 }
 0x362   :  { %v566_v21 = vpop.f32.mrf.mxu1 }
 0x364   :  { %v363_v22 = vpop.f32.mrf.mxu1 }
 0x365   :  { %404 = vrot.lane.b32.xlu0 %v363_v22, %s613_s3 }
 0x366   :  { %v569_v23 = vpop.f32.mrf.mxu1 }
 0x368   :  { %v368_v24 = vpop.f32.mrf.mxu1 }
 0x369   :  { %409 = vrot.lane.b32.xlu1 %v368_v24, %s614_s4 }
 0x36a   :  { %v572_v25 = vpop.f32.mrf.mxu1 }
 0x36c   :  { %v373_v26 = vpop.f32.mrf.mxu1 }
 0x36d   :  { %414 = vrot.lane.b32.xlu0 %v373_v26, %s615_s5 }
 0x36e   :  { %v575_v27 = vpop.f32.mrf.mxu1 }
 0x370   :  { %v378_v28 = vpop.f32.mrf.mxu1 }
 0x371   :  { %419 = vrot.lane.b32.xlu1 %v378_v28, %s616_s6  ;;  %423 = vrot.lane.b32.xlu0 %v649_v2, %s620_s8 }
 0x372   :  { %v578_v29 = vpop.f32.mrf.mxu1 }
 0x3c7   :  { %v385_v30 = vpop.permute.xlu0 %384 }
 0x3c8   :  { %v387_v32 = vadd.f32 %v385_v30, %v338_v12 }
 0x3cb   :  { %v390_v31 = vpop.permute.xlu1 %389 }
 0x3cc   :  { %v392_v34 = vadd.f32 %v390_v31, %v387_v32 }
 0x3cf   :  { %v395_v33 = vpop.permute.xlu0 %394 }
 0x3d0   :  { %v397_v36 = vadd.f32 %v395_v33, %v392_v34 }
 0x3d3   :  { %v400_v35 = vpop.permute.xlu1 %399 }
 0x3d4   :  { %v402_v38 = vadd.f32 %v400_v35, %v397_v36 }
 0x3d7   :  { %v405_v37 = vpop.permute.xlu0 %404 }
 0x3d8   :  { %v407_v40 = vadd.f32 %v405_v37, %v402_v38 }
 0x3db   :  { %v410_v39 = vpop.permute.xlu1 %409 }
 0x3dc   :  { %v412_v42 = vadd.f32 %v410_v39, %v407_v40 }
 0x3df   :  { %v415_v41 = vpop.permute.xlu0 %414 }
 0x3e0   :  { %v417_v43 = vadd.f32 %v415_v41, %v412_v42 }
 0x3e3   :  { %v420_v44 = vpop.permute.xlu1 %419  ;;  %v424_v45 = vpop.permute.xlu0 %423 }
 0x3e4   :  { %v422_v46 = vadd.f32 %v420_v44, %v417_v43 }
 0x3e6   :  { %v426_v47 = vmul.f32 %v424_v45, %v422_v46 }
 0x3e8   :  { %v427_v48 = vsel %vm253_vm4, %v426_v47, 0.0 }
 0x3e9   :  { %428 = vadd.xlane.f32.xlu1 %v427_v48 }
 0x472   :  { %v429_v49 = vpop.xlane.xlu1 %428 }
 0x473   :  { %v430_v50 = vmul.f32 0.25, %v429_v49 }
 0x475   :  { %v431_v51 = vsub.f32 %v422_v46, %v430_v50 }
 0x477   :  { %v432_v52 = vmul.f32 %v431_v51, %v424_v45 }
 0x479   :  { %v433_v53 = vmul.f32 %v432_v52, %v432_v52 }
 0x47b   :  { %v434_v54 = vsel %vm253_vm4, %v433_v53, 0.0 }
 0x47c   :  { %435 = vadd.xlane.f32.xlu0 %v434_v54 }
 0x492   :  { %445 = vrot.lane.b32.xlu0 %v649_v2, %s621_s9 }
 0x496   :  { %465 = vperm.xlu0 %600, %v444_v58  }
 0x505   :  { %v436_v55 = vpop.xlane.xlu0 %435 }
 0x506   :  { %v437_v56 = vmul.f32 0.25, %v436_v55 }
 0x508   :  { %v438_v57 = vadd.f32 1e-05, %v437_v56  ;;  %v441_v63 = vmul.f32 %v440_v60, %v437_v56 }
 0x509   :  { %v446_v59 = vpop.permute.xlu0 %445 }
 0x50a   :  { %603 = vrsqrt.f32 %v438_v57  ;;  %v448_v61 = vmul.f32 %v446_v59, %v444_v58 }
 0x511   :  { %v466_v11 = vpop.permute.xlu0 %465 }
 0x517   :  { %v604_v62 = vpop.eup %603 }
 0x518   :  { %v442_v1 = vmul.f32 %v604_v62, %v604_v62  ;;  %v449_v3 = vmul.f32 %v604_v62, %v448_v61 }
 0x51a   :  { %v443_v4 = vmul.f32 %v442_v1, %v441_v63 }
 0x51c   :  { %v450_v5 = vadd.f32 1e-05, %v443_v4 }
 0x51e   :  { %605 = vrsqrt.f32 %v450_v5 }
 0x52b   :  { %v606_v8 = vpop.eup %605 }
 0x52c   :  { %453 = vrot.lane.b32.xlu1 %v606_v8, %s621_s9 }
 0x59e   :  { %v454_v9 = vpop.permute.xlu1 %453 }
 0x59f   :  { %v456_v10 = vmul.f32 %v454_v9, %v449_v3 }
 0x5a1   :  { %459 = vperm.xlu1 %599, %v456_v10  }
 0x61c   :  { %v460_v2 = vpop.permute.xlu1 %459 }
 0x61d   :  { %v462_v12 = vmul.f32 %v460_v2, %v431_v51 }
 0x61f   :  { %v468_v13 = vadd.f32 %v466_v11, %v462_v12 }
 0x621   :  { %470 = vrot.lane.b32.xlu1 %v468_v13, %s624_s12 }
 0x693   :  { %v471_v14 = vpop.permute.xlu1 %470 }
 0x694   :  { %v474_v15 = vsel %vm473_vm5, %v468_v13, %v471_v14 }
 0x695   :  { %477 = vst.msk [vmem:[%s808_s2] sm:$0xff] %vm476_vm6, %v474_v15 }

</bundles_post_ra>
